<compile_context>
chip_gen: v6e
topology: v6e:2x2x1
jax: 0.10.0
libtpu: 0.0.40
codegen_flags: <defaults>
</compile_context>

<pallas_src>
import jax
import jax.numpy as jnp
from jax import lax
from jax.experimental import pallas as pl
from jax.experimental.pallas import tpu as pltpu


# --------------------------------------------------------------------------- #
# Kernel 1: fused K / V projection (1x1 convs), tiled over HW.
# --------------------------------------------------------------------------- #
def kv_project_kernel(x_ref, wkv_ref, bkv_ref, k_ref, v_ref):
    # x_ref:   (1, C, TP)            one spatial tile of the input
    # wkv_ref: (C, Cq_pad + C)       fused [Wk | Wv] weights (C_in, C_out)
    # bkv_ref: (Cq_pad + C, 1)       fused biases
    # k_ref:   (1, Cq_pad, TP)       f32
    # v_ref:   (1, C, TP)            bf16 (feeds the bf16 PV matmul)
    cqp = k_ref.shape[1]
    kv = lax.dot_general(
        wkv_ref[...], x_ref[0],
        dimension_numbers=(((0,), (0,)), ((), ())),          # W^T @ x -> (Cq_pad+C, TP)
        preferred_element_type=jnp.float32)
    kv = kv + bkv_ref[...]
    k_ref[0] = kv[:cqp, :]
    v_ref[0] = kv[cqp:, :].astype(v_ref.dtype)


# --------------------------------------------------------------------------- #
# Kernel 2: flash-style attention with key-tiled online softmax.
# grid = (B, HW // TQ, HW // TK); b, q "parallel", key axis "arbitrary".
# --------------------------------------------------------------------------- #
def cross_attn_kernel(x_ref, wq_ref, bq_ref, k_ref, v_ref, gamma_ref,
                      o_ref, q_scr, m_scr, l_scr, acc_scr):
    # x_ref:   (1, C, TQ)       streamed query tile (residual + source for q proj)
    # wq_ref:  (C, Cq_pad)      query 1x1-conv weight (zero-padded cols)
    # bq_ref:  (Cq_pad, 1)      query bias
    # k_ref:   (1, Cq_pad, TK)  key tile (f32)
    # v_ref:   (1, C, TK)       value tile (bf16)
    # gamma_ref: (1,) SMEM scalar
    # o_ref:   (1, C, TQ)
    # scratch: q_scr (Cq_pad, TQ), m_scr/l_scr (1, TQ), acc_scr (C, TQ)   all f32
    kt = pl.program_id(2)
    n_kt = pl.num_programs(2)

    @pl.when(kt == 0)
    def _():
        q = lax.dot_general(
            wq_ref[...], x_ref[0],
            dimension_numbers=(((0,), (0,)), ((), ())),       # Wq^T @ x -> (Cq_pad, TQ)
            preferred_element_type=jnp.float32)
        q_scr[...] = q + bq_ref[...]
        m_scr[...] = jnp.full_like(m_scr, -jnp.inf)
        l_scr[...] = jnp.zeros_like(l_scr)
        acc_scr[...] = jnp.zeros_like(acc_scr)

    # energy[j, i] = <k_j, q_i>  -> (TK, TQ): keys on sublanes, queries on lanes,
    # so softmax stats are (1, TQ) lane vectors (no transposes / reshapes needed).
    energy = lax.dot_general(
        k_ref[0], q_scr[...],
        dimension_numbers=(((0,), (0,)), ((), ())),
        preferred_element_type=jnp.float32)                   # (TK, TQ)

    m_prev = m_scr[...]
    m_new = jnp.maximum(m_prev, jnp.max(energy, axis=0, keepdims=True))   # (1, TQ)
    alpha = jnp.exp(m_prev - m_new)                                        # (1, TQ)
    p = jnp.exp(energy - m_new)                                            # (TK, TQ) f32
    l_scr[...] = alpha * l_scr[...] + jnp.sum(p, axis=0, keepdims=True)

    # Un-normalized PV contraction on the MXU with bf16 inputs, f32 accumulation.
    pv = lax.dot_general(
        v_ref[0], p.astype(jnp.bfloat16),
        dimension_numbers=(((1,), (0,)), ((), ())),
        preferred_element_type=jnp.float32)                   # (C, TQ)
    acc_scr[...] = alpha * acc_scr[...] + pv
    m_scr[...] = m_new

    @pl.when(kt == n_kt - 1)
    def _():
        # Normalize after the PV matmul (only C*TQ values), exact reciprocal.
        scale = gamma_ref[0] / l_scr[...]                     # (1, TQ)
        o_ref[0] = (acc_scr[...] * scale + x_ref[0]).astype(o_ref.dtype)


# --------------------------------------------------------------------------- #
# Wrapper
# --------------------------------------------------------------------------- #
def _vmem_capacity_bytes():
    try:
        info = pltpu.get_tpu_info()
        cap = getattr(info, "vmem_capacity_bytes", None)
        if cap:
            return int(cap)
    except Exception:
        pass
    return 64 << 20   # conservative fallback (v7x per-core VMEM)


def _pick_tile(hw, prefs):
    for t in prefs:
        if hw % t == 0:
            return t
    return hw


def cross_attention(x_nchw, wq, bq, wk, bk, wv, bv, gamma,
                    tile_q=None, tile_k=None):
    """x_nchw: (B, C, H, W) float32.  1x1-conv weights stored as (C_in, C_out)."""
    B, C, H, W = x_nchw.shape
    HW = H * W
    Cq = wq.shape[1]
    Cq_pad = max(8, ((Cq + 7) // 8) * 8)
    tot_kv = Cq_pad + C
    f32 = jnp.float32

    # Zero-padded query/key channels contribute exactly 0 to the energy contraction.
    wq_p = jnp.zeros((C, Cq_pad), f32).at[:, :Cq].set(wq.astype(f32))
    bq_p = jnp.zeros((Cq_pad, 1), f32).at[:Cq, 0].set(bq.astype(f32))
    wk_p = jnp.zeros((C, Cq_pad), f32).at[:, :Cq].set(wk.astype(f32))
    bk_p = jnp.zeros((Cq_pad,), f32).at[:Cq].set(bk.astype(f32))
    w_kv = jnp.concatenate([wk_p, wv.astype(f32)], axis=1)               # (C, tot_kv)
    b_kv = jnp.concatenate([bk_p, bv.astype(f32)]).reshape(tot_kv, 1)

    # NCHW -> (B, C, HW): pure reshape, no transposes.
    x_flat = x_nchw.reshape(B, C, HW).astype(f32)
    gamma_arr = jnp.asarray(gamma, f32).reshape(1)

    # Generation-aware tiling / VMEM budget.
    vmem_cap = _vmem_capacity_bytes()
    big_vmem = vmem_cap >= (96 << 20)                 # v5e/v6e: 128 MiB, v7x: 64 MiB
    TQ = tile_q if tile_q is not None else _pick_tile(
        HW, (512, 256, 128) if big_vmem else (256, 128))
    TK = tile_k if tile_k is not None else _pick_tile(
        HW, (1024, 512, 256, 128) if big_vmem else (512, 256, 128))
    assert HW % TQ == 0 and HW % TK == 0, (HW, TQ, TK)
    n_qt, n_kt = HW // TQ, HW // TK
    TP = TK                                           # projection spatial tile

    # Rough per-core VMEM need for the attention call (tiles, scratch, temporaries),
    # with 2x headroom, floored at 32 MiB (v5e default scoped limit is 16 MiB) and
    # capped at 85% of physical VMEM for compiler headroom.
    attn_bytes = (
        2 * C * TQ * 4                       # x tile (double-buffered)
        + 2 * C * TQ * 4                     # out tile
        + 2 * Cq_pad * TK * 4                # k tile
        + 2 * C * TK * 2                     # v tile (bf16)
        + 2 * C * Cq_pad * 4 + 2 * Cq_pad * 4  # wq, bq
        + (Cq_pad * TQ + 16 * TQ + C * TQ) * 4  # scratch (q, m, l, acc)
        + 3 * TK * TQ * 4                    # energy / probs / bf16 copy temporaries
        + 2 * C * TQ * 4                     # pv temp
    )
    vmem_limit = int(min(max(2 * attn_bytes, 32 << 20), int(0.85 * vmem_cap)))

    # ---- hoisted fused K / V projection --------------------------------------- #
    k_arr, v_arr = pl.pallas_call(
        kv_project_kernel,
        out_shape=(jax.ShapeDtypeStruct((B, Cq_pad, HW), f32),
                   jax.ShapeDtypeStruct((B, C, HW), jnp.bfloat16)),
        grid_spec=pltpu.PrefetchScalarGridSpec(
            num_scalar_prefetch=0,
            grid=(B, HW // TP),
            in_specs=[
                pl.BlockSpec((1, C, TP), lambda b, t: (b, 0, t)),
                pl.BlockSpec((C, tot_kv), lambda b, t: (0, 0)),
                pl.BlockSpec((tot_kv, 1), lambda b, t: (0, 0)),
            ],
            out_specs=[
                pl.BlockSpec((1, Cq_pad, TP), lambda b, t: (b, 0, t)),
                pl.BlockSpec((1, C, TP), lambda b, t: (b, 0, t)),
            ],
        ),
        compiler_params=pltpu.CompilerParams(
            dimension_semantics=("parallel", "parallel"),
            vmem_limit_bytes=vmem_limit,
        ),
    )(x_flat, w_kv, b_kv)

    # ---- key-tiled online-softmax attention ------------------------------------ #
    out_flat = pl.pallas_call(
        cross_attn_kernel,
        out_shape=jax.ShapeDtypeStruct((B, C, HW), f32),
        grid_spec=pltpu.PrefetchScalarGridSpec(
            num_scalar_prefetch=0,
            grid=(B, n_qt, n_kt),
            in_specs=[
                pl.BlockSpec((1, C, TQ), lambda b, q, kk: (b, 0, q)),   # x tile
                pl.BlockSpec((C, Cq_pad), lambda b, q, kk: (0, 0)),     # Wq
                pl.BlockSpec((Cq_pad, 1), lambda b, q, kk: (0, 0)),     # bq
                pl.BlockSpec((1, Cq_pad, TK), lambda b, q, kk: (b, 0, kk)),  # K tile
                pl.BlockSpec((1, C, TK), lambda b, q, kk: (b, 0, kk)),       # V tile
                pl.BlockSpec((1,), lambda b, q, kk: (0,),
                             memory_space=pltpu.MemorySpace.SMEM),      # gamma
            ],
            out_specs=pl.BlockSpec((1, C, TQ), lambda b, q, kk: (b, 0, q)),
            scratch_shapes=[
                pltpu.VMEM((Cq_pad, TQ), f32),   # q tile
                pltpu.VMEM((1, TQ), f32),        # running max
                pltpu.VMEM((1, TQ), f32),        # running sum
                pltpu.VMEM((C, TQ), f32),        # PV accumulator
            ],
        ),
        compiler_params=pltpu.CompilerParams(
            dimension_semantics=("parallel", "parallel", "arbitrary"),
            vmem_limit_bytes=vmem_limit,
        ),
    )(x_flat, wq_p, bq_p, k_arr, v_arr, gamma_arr)

    return out_flat.reshape(B, C, H, W)


# --------------------------------------------------------------------------- #
# Pure-JAX reference mirroring the PyTorch forward exactly (NCHW).
# --------------------------------------------------------------------------- #
def _reference(x_nchw, wq, bq, wk, bk, wv, bv, gamma):
    B, C, H, W = x_nchw.shape
    HW = H * W
    xf = x_nchw.reshape(B, C, HW)                                  # (B, C, HW)
    q = jnp.einsum('io,bip->bop', wq, xf) + bq[None, :, None]      # (B, Cq, HW)
    k = jnp.einsum('io,bip->bop', wk, xf) + bk[None, :, None]      # (B, Cq, HW)
    v = jnp.einsum('io,bip->bop', wv, xf) + bv[None, :, None]      # (B, C, HW)
    proj_query = jnp.transpose(q, (0, 2, 1))                       # (B, HW, Cq)
    energy = jnp.einsum('bic,bcj->bij', proj_query, k)             # (B, HW, HW)
    attention = jax.nn.softmax(energy, axis=-1)
    out = jnp.einsum('bcj,bij->bci', v, attention)                 # (B, C, HW)
    out = out.reshape(B, C, H, W)
    return gamma * out + x_nchw


if __name__ == "__main__":
    B, C, H, W = 2, 32, 16, 16          # C divisible by 8 -> Cq = 4, HW = 256
    Cq = C // 8

    key = jax.random.PRNGKey(0)
    kx, k1, k2, k3, k4, k5, k6 = jax.random.split(key, 7)

    x = jax.random.normal(kx, (B, C, H, W), dtype=jnp.float32)

    # 1x1 conv weights stored as (C_in, C_out) matrices.
    scale = 0.05
    wq = scale * jax.random.normal(k1, (C, Cq), dtype=jnp.float32)
    bq = scale * jax.random.normal(k2, (Cq,), dtype=jnp.float32)
    wk = scale * jax.random.normal(k3, (C, Cq), dtype=jnp.float32)
    bk = scale * jax.random.normal(k4, (Cq,), dtype=jnp.float32)
    wv = scale * jax.random.normal(k5, (C, C), dtype=jnp.float32)
    bv = scale * jax.random.normal(k6, (C,), dtype=jnp.float32)
    # gamma initializes to 0 in the PyTorch module; use a nonzero value so the
    # attention path is actually exercised in the check.
    gamma = jnp.float32(0.5)

    # tile_q=tile_k=128 on HW=256 exercises multiple query tiles AND the multi-step
    # online-softmax key loop.
    out = cross_attention(x, wq, bq, wk, bk, wv, bv, gamma, tile_q=128, tile_k=128)
    out = jax.block_until_ready(out)

    ref = _reference(x, wq, bq, wk, bk, wv, bv, gamma)
    assert out.shape == (B, C, H, W)
    max_err = float(jnp.max(jnp.abs(out - ref)))
    # bf16 PV inputs (f32 accumulation) bound the error well below 2e-3 here.
    assert jnp.allclose(out, ref, atol=2e-3, rtol=2e-3), max_err

    print("KERNEL_OK")
</pallas_src>

<mosaic_0001>
module attributes {stable_mosaic.version = 11 : i64} {
  func.func @kv_project_kernel(%arg0: i32, %arg1: i32, %arg2: memref<1x32x128xf32, #tpu.memory_space<vmem>>, %arg3: memref<32x40xf32, #tpu.memory_space<vmem>>, %arg4: memref<40x1xf32, #tpu.memory_space<vmem>>, %arg5: memref<1x8x128xf32, #tpu.memory_space<vmem>>, %arg6: memref<1x32x128xbf16, #tpu.memory_space<vmem>>) attributes {dimension_semantics = [#tpu.dimension_semantics<parallel>, #tpu.dimension_semantics<parallel>], iteration_bounds = array<i64: 2, 2>, scalar_prefetch = 0 : i64, scratch_operands = 0 : i64, tpu.core_type = #tpu.core_type<tc>, window_params = [{transform_indices = @transform_0, window_bounds = array<i64: 1, 32, 128>}, {pipeline_mode = #tpu.pipeline_mode<synchronous>, transform_indices = @transform_1, window_bounds = array<i64: 32, 40>}, {pipeline_mode = #tpu.pipeline_mode<synchronous>, transform_indices = @transform_2, window_bounds = array<i64: 40, 1>}, {transform_indices = @transform_3, window_bounds = array<i64: 1, 8, 128>}, {transform_indices = @transform_4, window_bounds = array<i64: 1, 32, 128>}]} {
    %c0 = arith.constant 0 : index
    %c0_0 = arith.constant 0 : index
    %0 = vector.load %arg3[%c0, %c0_0] : memref<32x40xf32, #tpu.memory_space<vmem>>, vector<32x40xf32>
    %c0_1 = arith.constant 0 : index
    %c0_2 = arith.constant 0 : index
    %c0_3 = arith.constant 0 : index
    %1 = vector.load %arg2[%c0_1, %c0_2, %c0_3] : memref<1x32x128xf32, #tpu.memory_space<vmem>>, vector<1x32x128xf32>
    %2 = vector.shape_cast %1 : vector<1x32x128xf32> to vector<32x128xf32>
    %cst = arith.constant dense<0.000000e+00> : vector<40x128xf32>
    %3 = tpu.matmul %0, %2, %cst {dimension_numbers = #tpu.dot_dimension_numbers<[0], [0], [1], [1], [0, 1, 1, 1], [], []>} : vector<32x40xf32>, vector<32x128xf32>, vector<40x128xf32> -> vector<40x128xf32>
    %c0_4 = arith.constant 0 : index
    %c0_5 = arith.constant 0 : index
    %4 = vector.load %arg4[%c0_4, %c0_5] : memref<40x1xf32, #tpu.memory_space<vmem>>, vector<40x1xf32>
    %5 = vector.broadcast %4 : vector<40x1xf32> to vector<40x128xf32>
    %6 = arith.addf %3, %5 : vector<40x128xf32>
    %7 = vector.extract_strided_slice %6 {offsets = [0, 0], sizes = [8, 128], strides = [1, 1]} : vector<40x128xf32> to vector<8x128xf32>
    %c0_6 = arith.constant 0 : index
    %c0_7 = arith.constant 0 : index
    %c0_8 = arith.constant 0 : index
    %8 = vector.load %arg5[%c0_6, %c0_7, %c0_8] : memref<1x8x128xf32, #tpu.memory_space<vmem>>, vector<1x8x128xf32>
    %9 = vector.shape_cast %8 : vector<1x8x128xf32> to vector<8x128xf32>
    %10 = vector.shape_cast %7 : vector<8x128xf32> to vector<1x8x128xf32>
    tpu.vector_store %arg5[%c0_6, %c0_7, %c0_8], %10 {strides = array<i32>} : memref<1x8x128xf32, #tpu.memory_space<vmem>>, vector<1x8x128xf32>,
    %11 = vector.extract_strided_slice %6 {offsets = [8, 0], sizes = [32, 128], strides = [1, 1]} : vector<40x128xf32> to vector<32x128xf32>
    %12 = arith.truncf %11 : vector<32x128xf32> to vector<32x128xbf16>
    %c0_9 = arith.constant 0 : index
    %c0_10 = arith.constant 0 : index
    %c0_11 = arith.constant 0 : index
    %13 = vector.load %arg6[%c0_9, %c0_10, %c0_11] : memref<1x32x128xbf16, #tpu.memory_space<vmem>>, vector<1x32x128xbf16>
    %14 = vector.shape_cast %13 : vector<1x32x128xbf16> to vector<32x128xbf16>
    %15 = vector.shape_cast %12 : vector<32x128xbf16> to vector<1x32x128xbf16>
    tpu.vector_store %arg6[%c0_9, %c0_10, %c0_11], %15 {strides = array<i32>} : memref<1x32x128xbf16, #tpu.memory_space<vmem>>, vector<1x32x128xbf16>,
    return
  }
  func.func @transform_0(%arg0: i32, %arg1: i32) -> (i32, i32, i32) {
    %c0_i32 = arith.constant 0 : i32
    %c0_i32_0 = arith.constant 0 : i32
    return %arg0, %c0_i32, %arg1 : i32, i32, i32
  }
  func.func @transform_1(%arg0: i32, %arg1: i32) -> (i32, i32) {
    %c0_i32 = arith.constant 0 : i32
    %c0_i32_0 = arith.constant 0 : i32
    %c0_i32_1 = arith.constant 0 : i32
    return %c0_i32, %c0_i32_0 : i32, i32
  }
  func.func @transform_2(%arg0: i32, %arg1: i32) -> (i32, i32) {
    %c0_i32 = arith.constant 0 : i32
    %c0_i32_0 = arith.constant 0 : i32
    %c0_i32_1 = arith.constant 0 : i32
    return %c0_i32, %c0_i32_0 : i32, i32
  }
  func.func @transform_3(%arg0: i32, %arg1: i32) -> (i32, i32, i32) {
    %c0_i32 = arith.constant 0 : i32
    %c0_i32_0 = arith.constant 0 : i32
    return %arg0, %c0_i32, %arg1 : i32, i32, i32
  }
  func.func @transform_4(%arg0: i32, %arg1: i32) -> (i32, i32, i32) {
    %c0_i32 = arith.constant 0 : i32
    %c0_i32_0 = arith.constant 0 : i32
    return %arg0, %c0_i32, %arg1 : i32, i32, i32
  }
}

</mosaic_0001>

<bundles_post_ra>
// kernel: tpu_custom_call.1
= control target key start
LH: loop header
LB: loop body
LE: loop exit
PB: predicated region body
PF: predicated region fallthrough
CT: control target
= control target key end

     0   :  { %10 = vsyncpa [#allocation3], 0  ;;  %s1200_s0 = inlined_call_operand.hbm [shape: f32[2,32,256], index: 0, kind: input, shape index: {}]   ;;  %s1201_s1 = inlined_call_operand.vmem [shape: f32[32,40], index: 1, kind: input, shape index: {}]   ;;  %s1202_s2 = inlined_call_operand.vmem [shape: f32[40,1], index: 2, kind: input, shape index: {}]   ;;  %s1203_s3 = inlined_call_operand.hbm [shape: f32[2,8,256], index: 3, kind: output, shape index: {0}]   ;;  %s1204_s4 = inlined_call_operand.hbm [shape: bf16[2,32,256], index: 4, kind: output, shape index: {1}]  }
   0x1   :  { %12 = vsyncpa [#allocation3 + $0x1], 0 }
   0x2   :  { %13 = vsyncpa [#allocation4], 0 }
   0x3   :  { %15 = vsyncpa [#allocation4 + $0x1], 0 }
   0x4   :  { %16 = vsyncpa [#allocation7], 0 }
   0x5   :  { %18 = vsyncpa [#allocation7 + $0x1], 0  ;;  %s970_s15 = smov 0   ;;  %s972_s16 = smov 0  }
   0x6   :  { %s974_s17 = smov 0   ;;  %s976_s18 = smov 0  }
   0x7   :  { %s978_s19 = smov 0   ;;  %s980_s20 = smov 0  }
   0x8   :  { %s982_s21 = smov 0   ;;  %s984_s22 = smov 0  }
   0x9 LB: > { %1208 = sst [smem:[#allocation11_spill]] %s903_s15  ;;  %s600_s23 = sadd.s32 4294967295, %s931_s22   ;;  %s931_s22 = sphi %s984_s22, %s24_s22   ;;  %s927_s21 = sphi %s982_s21, %s1225_s21   ;;  %s923_s20 = sphi %s980_s20, %s1224_s20   ;;  %s919_s19 = sphi %s978_s19, %s1223_s19   ;;  %s915_s18 = sphi %s976_s18, %s1222_s18   ;;  %s911_s17 = sphi %s974_s17, %s1221_s17   ;;  %s907_s16 = sphi %s972_s16, %s1220_s16   ;;  %s903_s15 = sphi %s970_s15, %s1219_s15  }
   0xa   : > { %s601_s24 = sadd.s32 4294967294, %s931_s22   ;;  %s33_s25 = sadd.s32 1, %s923_s20 }
   0xb   : > { %s36_s26 = sadd.s32 1, %s927_s21  ;;  %p34_p0 = scmp.ge.s32.totalorder %s33_s25, 2 }
   0xc   : > { %s45_s27 = sadd.s32 1, %s911_s17  ;;  %p52_p1 = scmp.ne.s32.totalorder %s911_s17, %s907_s16 }
   0xd   : > { %p53_p2 = scmp.eq.s32.totalorder %s931_s22, 0  ;;  %s1227_s25 = smov (%p34_p0, %s33_s25), 0 }
   0xe   : > { %1209 = sst [smem:[#allocation12_spill]] %s1227_s25  ;;  %s1229_s26 = smov (!%p34_p0, %s36_s26), %s927_s21 }
   0xf   : > { %s41_s28 = ssub.s32 %s923_s20, %s1227_s25  ;;  %p1023_p3 = por %p53_p2, %p52_p1 }
  0x10   : > { %p38_p4 = scmp.ge.s32.totalorder %s1229_s26, 2  ;;  %p58_p5 = scmp.ne.s32.totalorder %s907_s16, %s903_s15 }
  0x11   : > { %p59_p6 = scmp.eq.s32.totalorder %s600_s23, 0  ;;  %p126_p7 = scmp.eq.s32.totalorder %s600_s23, 3 }
  0x12   : > { %s1231_s26 = smov (%p38_p4, %s1229_s26), 0  ;;  %p132_p10 = scmp.eq.s32.totalorder %s601_s24, 3 }
  0x13   : > { %1211 = sst [smem:[#allocation13_spill]] %s1231_s26  ;;  %p1031_p8 = por %p59_p6, %p58_p5 }
  0x14   : > { %p1035_p9 = por %p126_p7, %p52_p1  ;;  %s40_s6 = ssub.s32 %s927_s21, %s1231_s26 }
  0x15   : > { %s42_s7 = sor.u32 %s41_s28, %s40_s6  ;;  %p1041_p12 = por %p132_p10, %p58_p5 }
  0x16   : > { %p43_p11 = scmp.eq.s32.totalorder %s42_s7, 0  ;;  %p700_p13 = scmp.lt.s32.totalorder %s931_s22, 4 }
  0x17   : > { %s186_s9 = sand.u32 1, %s911_s17   ;;  %s605_s12 = sshll.u32 %s927_s21, 3 }
  0x18   : > { %s1048_s10 = scalar_select %p43_p11, %s911_s17, %s45_s27  }
  0x19   : > { %s604_s11 = sshll.u32 %s186_s9, 5  ;;  %s195_s13 = sadd.s32 %s923_s20, %s605_s12 }
  0x1a   : > { %s190_s14 = scalar_lea.vmem [#allocation2], %s604_s11  ;;  %s606_s25 = sshll.u32 %s195_s13, 7 }
  0x1b   : > { %s198_s23 = sshll.u32 %s190_s14, 4  ;;  %s197_s24 = scalar_lea.hbm %s1200_s0, %s606_s25  ;;  %s199_s23 = int_to_ptr.vmem [resolvable:$true] %s198_s23 }
  0x1c   : > { %p1057_p0 = pnand %p700_p13, %p1023_p3  ;;  %s187_s6 = scalar_lea.sflag [#allocation3], %s186_s9 }
  0x1d   : > { %s790_s27 = scalar_lea.vmem %s199_s23, 512  ;;  %s933_s7 = smov [#allocation2]  }
  0x1e   : > { %p779_p1 = pneg %p1057_p0  ;;  %p791_p2 = scmp.ne.s32.totalorder %s199_s23, %s790_s27 }
  0x1f   : > { %s795_s11 = sshll.u32 %s933_s7, 4  ;;  %s796_s11 = int_to_ptr.vmem [resolvable:$false] %s795_s11 }
  0x20   : > { %p793_p4 = pnand %p791_p2, %p779_p1  ;;  %s797_s12 = scalar_lea.vmem %s796_s11, 1024 }
  0x21   : > { %p798_p6 = scmp.lt.s32.totalorder %s199_s23, %s796_s11  ;;  %p799_p7 = scmp.lt.s32.totalorder %s797_s12, %s790_s27 }
  0x22   : > { %p794_p5 = pneg %p793_p4 }
  0x23   : > { %p800_p10 = por %p799_p7, %p798_p6 }
  0x25   : > { %p801_p11 = pnand %p800_p10, %p794_p5 }
  0x27   : > { %804 = shalt.err (!%p801_p11)
}
  0x28   : > { %s934_s15 = smov 256   ;;  %s935_s25 = smov 128  }
  0x29   : > { %s936_s26 = smov 8   ;;  %p607_p3 = scmp.ge.s32.totalorder %s931_s22, 1 }
  0x2a   : > { %692 = dma.hbm_to_vmem [thread:$0]  (!%p1057_p0), %s197_s24, 512, %s199_s23, %s187_s6, %s934_s15, %s935_s25, %s936_s26  }
  0x2b   : > { %p206_p13 = scmp.lt.s32.totalorder %s931_s22, 5 }
  0x2d   : > { %p207_p1 = pnand %p607_p3, %p206_p13 }
  0x2e   : > { %s1068_s29 = sand.u32 (!%p207_p1), 1, %s907_s16  }
  0x2f   : > { %210 = sbr.rel (%p207_p1) target bundleno = 417 (0x1a1), region = 32  ;;  %s608_s9 = sshll.u32 (!%p207_p1), %s1068_s29, 5 }
  0x30   : > { %s213_s13 = scalar_lea.sflag (!%p207_p1), [#allocation3], %s1068_s29  ;;  %s216_s14 = scalar_lea.vmem (!%p207_p1), [#allocation2], %s608_s9 }
  0x34   : > { %890 = dma.done.wait (%p1031_p8), %s213_s13, 512  }
  0x35   : > { %892 = vsyncadd (%p1031_p8), %s213_s13, 4294966784  ;;  %v937_v0 = vmov 0.0   ;;  %vm938_vm0 = vmmov 0   ;;  %v246_v1 = vld [vmem:[%s1201_s1] sm:$0xff]  ;;  %v253_v2 = vld [vmem:[%s216_s14 + $0x18] sm:$0xff]  ;;  %v939_v10 = vmov 0  }
  0x36   : > { %652 = vmatprep.subr.mxu0 %v937_v0  ;;  %660 = vmatprep.mubr.msk.f32.mxu0 %vm938_vm0, %v937_v0  ;;  %v252_v3 = vld [vmem:[%s216_s14 + $0x10] sm:$0xff]  ;;  %v247_v4 = vld [vmem:[%s1201_s1 + $0x8] sm:$0xff]  ;;  %v250_v6 = vld [vmem:[%s216_s14] sm:$0xff]  ;;  %vm316_vm1 = vcmask 261120   ;;  %s622_s6 = sshll.u32 %s919_s19, 1  ;;  %s609_s30 = sshll.u32 %s1068_s29, 3 }
  0x37   : > { %675 = vmatprep.subr.mxu1 %v937_v0  ;;  %669 = vmatprep.mubr.msk.f32.mxu1 %vm938_vm0, %v937_v0  ;;  %v251_v5 = vld [vmem:[%s216_s14 + $0x8] sm:$0xff]  ;;  %v248_v7 = vld [vmem:[%s1201_s1 + $0x10] sm:$0xff]  ;;  %v249_v8 = vld [vmem:[%s1201_s1 + $0x18] sm:$0xff]  ;;  %s460_s27 = sadd.s32 %s915_s18, %s622_s6  ;;  %s238_s11 = scalar_lea.vmem [#allocation5], %s609_s30 }
  0x38   : > { %284 = vxpose.xlu0.b32.start [1/4] (short) (narrow) %v246_v1, 40  ;;  %653 = vmatpush3.msra.mxu0 %v253_v2  ;;  %v255_v9 = vld [vmem:[%s1202_s2 + $0x8] sm:$0xff]  ;;  %v256_v11 = vld [vmem:[%s1202_s2 + $0x10] sm:$0xff]  ;;  %v257_v12 = vld [vmem:[%s1202_s2 + $0x18] sm:$0xff]  ;;  %s623_s7 = sshll.u32 %s460_s27, 7  ;;  %s464_s12 = sshll.u32 %s238_s11, 4  ;;  %s1116_s12 = int_to_ptr.vmem [resolvable:$true] %s464_s12 }
  0x39   : > { %679 = vmatpush3.msra.mxu1 %v253_v2  ;;  %654 = vmatprep.subr.mxu0 %v937_v0  ;;  %v258_v13 = vld [vmem:[%s1202_s2 + $0x20] sm:$0xff]  ;;  %s1114_s26 = scalar_lea.hbm %s1203_s3, %s623_s7  ;;  %s444_s9 = scalar_lea.sflag [#allocation4], %s1068_s29 }
  0x3a   : > { %676 = vmatprep.subr.mxu1 %v937_v0  ;;  %655 = vmatpush3.msra.mxu0 %v252_v3  ;;  %v254_v14 = vld [vmem:[%s1202_s2] sm:$0xff]  ;;  %s805_s13 = scalar_lea.vmem %s1116_s12, 128  ;;  %s940_s14 = smov [#allocation5]  }
  0x3b   : > { %680 = vmatpush3.msra.mxu1 %v252_v3  ;;  %656 = vmatprep.subr.mxu0 %v937_v0  ;;  %p806_p8 = scmp.ne.s32.totalorder %s1116_s12, %s805_s13  ;;  %s809_s23 = sshll.u32 %s940_s14, 4  ;;  %s810_s23 = int_to_ptr.vmem [resolvable:$false] %s809_s23 }
  0x3c   : > { %285 = vxpose.xlu0.b32.cont [2/4] (short) (narrow) %v247_v4, 40  ;;  %657 = vmatpush3.msra.mxu0 %v251_v5  ;;  %s811_s24 = scalar_lea.vmem %s810_s23, 256  ;;  %p812_p4 = scmp.lt.s32.totalorder %s1116_s12, %s810_s23 }
  0x3d   : > { %677 = vmatprep.subr.mxu1 %v937_v0  ;;  %658 = vmatprep.subr.mxu0 %v937_v0  ;;  %p807_p0 = pnand %p806_p8, %p1035_p9  ;;  %p813_p5 = scmp.lt.s32.totalorder %s811_s24, %s805_s13 }
  0x3e   : > { %681 = vmatpush3.msra.mxu1 %v251_v5  ;;  %659 = vmatpush3.msra.mxu0 %v250_v6 }
  0x3f   : > { %678 = vmatprep.subr.mxu1 %v937_v0  ;;  %775 = vset.pattern.permute.xlu1 %v939_v10  ;;  %p808_p2 = pneg %p807_p0  ;;  %p814_p6 = por %p813_p5, %p812_p4 }
  0x40   : > { %286 = vxpose.xlu0.b32.cont [3/4] (short) (narrow) %v248_v7, 40  ;;  %682 = vmatpush3.msra.mxu1 %v250_v6 }
  0x41   : > { %266 = vperm.xlu1 %775, %v255_v9   ;;  %p815_p7 = pnand %p814_p6, %p808_p2 }
  0x44   : > { %287 = vxpose.xlu0.b32.end [4/4] (short) (narrow) %v249_v8, 40 }
  0x45   : > { %271 = vperm.xlu1 %775, %v256_v11  }
  0x49   : > { %276 = vperm.xlu1 %775, %v257_v12  }
  0x4d   : > { %281 = vperm.xlu1 %775, %v258_v13  }
  0x6d   : > { %776 = vset.pattern.permute.xlu0 %v939_v10 }
  0x71   : > { %261 = vperm.xlu0 %776, %v254_v14  }
  0xb4   : > { %v300_v15 = vpop.trf.xlu0 }
  0xb5   : > { %661 = vmatmul.mubr.msk.f32.vlgmr.msra.gmra.mxu0 %vm316_vm1, %v300_v15 }
  0xb6   : > { %663 = vmatprep.mubr.msk.f32.mxu0 %vm938_vm0, %v937_v0 }
  0xb8   : > { %v301_v16 = vpop.trf.xlu0 }
  0xb9   : > { %664 = vmatmul.mubr.msk.f32.gmra.mxu0 %vm316_vm1, %v301_v16 }
  0xba   : > { %666 = vmatprep.mubr.msk.f32.mxu0 %vm938_vm0, %v937_v0 }
  0xbc   : > { %v302_v17 = vpop.trf.xlu0  ;;  %v267_v20 = vpop.permute.xlu1 %266 }
  0xbd   : > { %667 = vmatmul.mubr.msk.f32.gmra.mxu0 %vm316_vm1, %v302_v17 }
  0xc0   : > { %v303_v18 = vpop.trf.xlu0  ;;  %v272_v25 = vpop.permute.xlu1 %271 }
  0xc1   : > { %670 = vmatmul.mubr.msk.f32.vlgmr.msra.gmra.mxu1 %vm316_vm1, %v303_v18 }
  0xc2   : > { %672 = vmatprep.mubr.msk.f32.mxu1 %vm938_vm0, %v937_v0 }
  0xc4   : > { %v304_v19 = vpop.trf.xlu0 }
  0xc5   : > { %673 = vmatmul.mubr.msk.f32.gmra.mxu1 %vm316_vm1, %v304_v19 }
  0xec   : > { %v262_v21 = vpop.permute.xlu0 %261 }
 0x175   : > { %v398_v22 = vpop.f32.mrf.mxu0 }
 0x176   : > { %v399_v23 = vadd.f32 %v398_v22, %v262_v21 }
 0x177   : > { %v662_v24 = vpop.f32.mrf.mxu0 }
 0x178   : > { %422 = vst [vmem:[%s238_s11] sm:$0xff] %v399_v23 }
 0x179   : > { %v403_v26 = vpop.f32.mrf.mxu0 }
 0x17a   : > { %818 = shalt.err (!%p815_p7)
}
 0x17b   : > { %s819_s28 = scalar_lea.hbm %s1114_s26, 128  ;;  %s823_s27 = scalar_lea.hbm %s1203_s3, 512 }
 0x17c   : > { %p820_p10 = scmp.ne.s32.totalorder %s1114_s26, %s819_s28  ;;  %p824_p13 = scmp.lt.s32.totalorder %s1114_s26, %s1203_s3 }
 0x17d   : > { %p825_p1 = scmp.lt.s32.totalorder %s823_s27, %s819_s28 }
 0x17e   : > { %p821_p11 = pnand %p820_p10, %p1035_p9 }
 0x17f   : > { %p826_p8 = por %p825_p1, %p824_p13 }
 0x180   : > { %p822_p3 = pneg %p821_p11 }
 0x182   : > { %p827_p0 = pnand %p826_p8, %p822_p3 }
 0x184   : > { %830 = shalt.err (!%p827_p0)
}
 0x185   : > { %685 = dma.vmem_to_hbm [thread:$0]  (%p1035_p9), %s1116_s12, 128, %s1114_s26, %s444_s9   ;;  %v665_v27 = vpop.f32.mrf.mxu0  ;;  %v404_v29 = vadd.f32 %v403_v26, %v267_v20  ;;  %v277_v31 = vpop.permute.xlu1 %276 }
 0x186   : > { %s610_s15 = sshll.u32 %s1068_s29, 4  ;;  %s624_s25 = sshll.u32 %s919_s19, 3  ;;  %v413_v34 = vpop.f32.mrf.mxu1 }
 0x187   : > { %v408_v28 = vpop.f32.mrf.mxu0  ;;  %s475_s13 = sadd.s32 %s915_s18, %s624_s25  ;;  %s245_s14 = scalar_lea.vmem [#allocation6], %s610_s15  ;;  %v414_v38 = vadd.f32 %v413_v34, %v277_v31 }
 0x188   : > { %v409_v30 = vadd.f32 %v408_v28, %v272_v25  ;;  %s478_s23 = sshll.u32 %s245_s14, 4  ;;  %v671_v35 = vpop.f32.mrf.mxu1  ;;  %s625_s24 = sshll.u32 %s475_s13, 6  ;;  %s1142_s23 = int_to_ptr.vmem [resolvable:$true] %s478_s23 }
 0x189   : > { %v668_v32 = vpop.f32.mrf.mxu0  ;;  %v282_v36 = vpop.permute.xlu1 %281  ;;  %s1147_s18 = scalar_lea.hbm %s1204_s4, %s625_s24  ;;  %s449_s26 = scalar_lea.sflag [#allocation7], %s1068_s29 }
 0x18a   : > { %v635_v33 = vpack.c.bf16 %v409_v30, %v404_v29  ;;  %v418_v37 = vpop.f32.mrf.mxu1  ;;  %s831_s9 = scalar_lea.vmem %s1142_s23, 256  ;;  %s941_s28 = smov [#allocation6]  }
 0x18b   : > { %v419_v39 = vadd.f32 %v418_v37, %v282_v36  ;;  %p832_p2 = scmp.ne.s32.totalorder %s1142_s23, %s831_s9  ;;  %s835_s6 = sshll.u32 %s941_s28, 4  ;;  %s836_s6 = int_to_ptr.vmem [resolvable:$false] %s835_s6 }
 0x18c   : > { %636 = vst [vmem:[%s245_s14] sm:$0xff] %v635_v33   ;;  %v674_v40 = vpop.f32.mrf.mxu1  ;;  %s837_s30 = scalar_lea.vmem %s836_s6, 512  ;;  %p838_p6 = scmp.lt.s32.totalorder %s1142_s23, %s836_s6 }
 0x18d   : > { %v640_v41 = vpack.c.bf16 %v419_v39, %v414_v38  ;;  %p833_p4 = pnand %p832_p2, %p1035_p9  ;;  %p839_p7 = scmp.lt.s32.totalorder %s837_s30, %s831_s9 }
 0x18f   : > { %642 = vst [vmem:[%s245_s14 + $0x8] sm:$0xff] %v640_v41   ;;  %p834_p5 = pneg %p833_p4  ;;  %p840_p10 = por %p839_p7, %p838_p6 }
 0x191   : > { %p841_p11 = pnand %p840_p10, %p834_p5 }
 0x193   : > { %844 = shalt.err (!%p841_p11)
}
 0x194   : > { %s845_s27 = scalar_lea.hbm %s1147_s18, 256  ;;  %s849_s15 = scalar_lea.hbm %s1204_s4, 1024 }
 0x195   : > { %p846_p3 = scmp.ne.s32.totalorder %s1147_s18, %s845_s27  ;;  %p850_p8 = scmp.lt.s32.totalorder %s1147_s18, %s1204_s4 }
 0x196   : > { %p851_p0 = scmp.lt.s32.totalorder %s849_s15, %s845_s27 }
 0x197   : > { %p847_p13 = pnand %p846_p3, %p1035_p9 }
 0x198   : > { %p852_p2 = por %p851_p0, %p850_p8 }
 0x199   : > { %p848_p1 = pneg %p847_p13 }
 0x19b   : > { %p853_p4 = pnand %p852_p2, %p848_p1 }
 0x19d   : > { %856 = shalt.err (!%p853_p4)
}
 0x19e   : > { %s942_s14 = smov 64   ;;  %s943_s24 = smov 128  }
 0x19f   : > { %s944_s19 = smov 4  }
 0x1a0   : > { %686 = dma.vmem_to_hbm [thread:$0]  (%p1035_p9), %s1142_s23, 256, %s1147_s18, %s449_s26, %s942_s14, %s943_s24, %s944_s19  }
 0x1a1 PF: > { %s1216_s12 = sld [smem:[#allocation11_spill]]  ;;  %p701_p5 = scmp.ge.s32.totalorder %s931_s22, 2 }
 0x1a3   : > { %p694_p6 = pnand %p701_p5, %p1041_p12 }
 0x1a5   : > { %p695_p7 = pneg %p694_p6 }
 0x1a7   : > { %s493_s9 = sand.u32 1, %s1216_s12  }
 0x1a8   : > { %s494_s28 = scalar_lea.sflag [#allocation4], %s493_s9 }
 0x1a9   : > { %894 = dma.done.wait (%p695_p7), %s494_s28, 128  }
 0x1aa   : > { %896 = vsyncadd (%p695_p7), %s494_s28, 4294967168  ;;  %s503_s6 = scalar_lea.sflag [#allocation7], %s493_s9 }
 0x1ab   : > { %898 = dma.done.wait (%p695_p7), %s503_s6, 256  }
 0x1ac   : > { %900 = vsyncadd (%p695_p7), %s503_s6, 4294967040  ;;  %s24_s22 = sadd.s32 1, %s931_s22   ;;  %s1217_s5 = sld [smem:[#allocation12_spill]] }
 0x1ad   : > { %p21_p10 = scmp.ge.s32.totalorder %s24_s22, 6   ;;  %s1218_s29 = sld [smem:[#allocation13_spill]] }
 0x1ae   : > { %s1219_s15 = smov %s907_s16  ;;  %s1220_s16 = smov %s911_s17 }
 0x1af   : > { %s1221_s17 = smov %s1048_s10  ;;  %s1222_s18 = smov %s923_s20 }
 0x1b0   : > { %s1223_s19 = smov %s927_s21  ;;  %23 = sbr.rel (!%p21_p10) target bundleno = 9 (0x9), region = 94 }
 0x1b2   : > { %s1224_s20 = smov %s1217_s5 }
 0x1b3   : > { %s1225_s21 = smov %s1218_s29 }
 0x1b5   :  { %508 = vsyncpa [#allocation3], 1 }
 0x1b6   :  { %510 = vsyncpa [#allocation3 + $0x1], 1 }
 0x1b7   :  { %511 = vsyncpa [#allocation4], 1 }
 0x1b8   :  { %513 = vsyncpa [#allocation4 + $0x1], 1 }
 0x1b9   :  { %514 = vsyncpa [#allocation7], 1 }
 0x1ba   :  { %516 = vsyncpa [#allocation7 + $0x1], 1 }

</bundles_post_ra>
